<compile_context>
chip_gen: v7x
topology: tpu7x:2x2x1
jax: 0.10.0
libtpu: 0.0.40
codegen_flags: <defaults>
</compile_context>

<pallas_src>
import jax
import jax.numpy as jnp
from jax.experimental import pallas as pl
from jax.experimental.pallas import tpu as pltpu


_TB_MAX = 2048   # batch-tile rows; (tb,10) lane-pads to (tb,128) in VMEM, so
                 # double-buffered footprint is ~2*(1+1) MiB at tb=2048.


def _encoder_kernel(x_ref, w_ref, b_ref, o_ref):
    # Hot path: matmul (MXU) + bias add + ReLU (VPU) on one batch tile.
    x = x_ref[...]                       # (TB, D_in)
    w = w_ref[...]                       # (D_in, D_out)  (resident across grid)
    b = b_ref[...]                       # (1, D_out)     (resident across grid)
    acc = jnp.dot(x, w, preferred_element_type=jnp.float32)   # (TB, D_out)
    o_ref[...] = jnp.maximum(acc + b, 0.0).astype(o_ref.dtype)


def _round_up(n, m):
    return -(-n // m) * m


def pallas_encoder(x, w, b, *, tb_max=_TB_MAX):
    """x: (B, D_in) f32, w: (D_in, D_out) f32, b: (D_out,) f32 -> (B, D_out) f32."""
    B, D_in = x.shape
    D_out = w.shape[1]
    b2 = b.reshape(1, D_out)             # 2-D for a clean (1, D_out) VMEM tile

    # Batch tile: multiple of 8 (sublane), aim for >=4 grid steps so v7x's two
    # TensorCores split the batch axis, capped at tb_max. Tiny B -> one full
    # block (block dim == full array dim is always legal).
    if B < 8:
        tb = B
    else:
        tb = min(tb_max, max(8, _round_up(pl.cdiv(B, 4), 8)))
    grid = (pl.cdiv(B, tb),)             # ragged last tile handled by Pallas

    out = pl.pallas_call(
        _encoder_kernel,
        out_shape=jax.ShapeDtypeStruct((B, D_out), jnp.float32),
        grid=grid,
        in_specs=[
            pl.BlockSpec((tb, D_in), lambda i: (i, 0)),      # streamed x tiles
            pl.BlockSpec((D_in, D_out), lambda i: (0, 0)),   # resident weights
            pl.BlockSpec((1, D_out), lambda i: (0, 0)),      # resident bias
        ],
        out_specs=pl.BlockSpec((tb, D_out), lambda i: (i, 0)),
        compiler_params=pltpu.CompilerParams(
            dimension_semantics=("parallel",),   # v7x: shard batch across 2 TCs
            vmem_limit_bytes=32 << 20,           # headroom on v5e (16 MiB default)
        ),
        cost_estimate=pl.CostEstimate(
            flops=2 * B * D_in * D_out,
            transcendentals=0,
            bytes_accessed=4 * (B * D_in + D_in * D_out + D_out + B * D_out),
        ),
    )(x, w, b2)
    return out


def init_params(key, input_dim=10, hidden=32):
    # Deterministic synthetic init mirroring nn.Linear(input_dim, 32):
    # weight (out, in) -> stored transposed as (in, out); bias (out,).
    kw, kb = jax.random.split(key)
    limit = jnp.sqrt(6.0 / (input_dim + hidden))  # xavier_uniform_-style bound
    w = jax.random.uniform(kw, (input_dim, hidden), jnp.float32, -limit, limit)
    b = jax.random.uniform(kb, (hidden,), jnp.float32, -0.1, 0.1)
    return w, b


if __name__ == "__main__":
    key = jax.random.PRNGKey(0)
    kx, kp = jax.random.split(key)

    batch = 8
    input_dim = 10
    hidden = 32

    x = jax.random.normal(kx, (batch, input_dim), jnp.float32)
    w, b = init_params(kp, input_dim, hidden)

    y = pallas_encoder(x, w, b)
    jax.block_until_ready(y)

    # Reference check (plain JAX) — same math as nn.Linear + ReLU.
    y_ref = jnp.maximum(x @ w + b[None, :], 0.0)
    assert y.shape == (batch, hidden)
    assert jnp.allclose(y, y_ref, atol=1e-5, rtol=1e-5)

    print("KERNEL_OK")
</pallas_src>

<mosaic_0001>
module attributes {stable_mosaic.version = 11 : i64} {
  func.func @_encoder_kernel(%arg0: i32, %arg1: memref<8x10xf32, #tpu.memory_space<vmem>>, %arg2: memref<10x32xf32, #tpu.memory_space<vmem>>, %arg3: memref<1x32xf32, #tpu.memory_space<vmem>>, %arg4: memref<8x32xf32, #tpu.memory_space<vmem>>) attributes {dimension_semantics = [#tpu.dimension_semantics<parallel>], iteration_bounds = array<i64: 1>, scalar_prefetch = 0 : i64, scratch_operands = 0 : i64, tpu.core_type = #tpu.core_type<tc>, window_params = [{transform_indices = @transform_0, window_bounds = array<i64: 8, 10>}, {pipeline_mode = #tpu.pipeline_mode<synchronous>, transform_indices = @transform_1, window_bounds = array<i64: 10, 32>}, {pipeline_mode = #tpu.pipeline_mode<synchronous>, transform_indices = @transform_2, window_bounds = array<i64: 1, 32>}, {transform_indices = @transform_3, window_bounds = array<i64: 8, 32>}]} {
    %c0 = arith.constant 0 : index
    %c0_0 = arith.constant 0 : index
    %0 = vector.load %arg1[%c0, %c0_0] : memref<8x10xf32, #tpu.memory_space<vmem>>, vector<8x10xf32>
    %c0_1 = arith.constant 0 : index
    %c0_2 = arith.constant 0 : index
    %1 = vector.load %arg2[%c0_1, %c0_2] : memref<10x32xf32, #tpu.memory_space<vmem>>, vector<10x32xf32>
    %c0_3 = arith.constant 0 : index
    %c0_4 = arith.constant 0 : index
    %2 = vector.load %arg3[%c0_3, %c0_4] : memref<1x32xf32, #tpu.memory_space<vmem>>, vector<1x32xf32>
    %cst = arith.constant dense<0.000000e+00> : vector<8x32xf32>
    %3 = tpu.matmul %0, %1, %cst {dimension_numbers = #tpu.dot_dimension_numbers<[1], [0], [0], [1], [0, 0, 1, 1], [], []>} : vector<8x10xf32>, vector<10x32xf32>, vector<8x32xf32> -> vector<8x32xf32>
    %4 = vector.broadcast %2 : vector<1x32xf32> to vector<8x32xf32>
    %5 = arith.addf %3, %4 : vector<8x32xf32>
    %cst_5 = arith.constant 0.000000e+00 : f32
    %6 = vector.broadcast %cst_5 : f32 to vector<8x32xf32>
    %7 = arith.maximumf %5, %6 : vector<8x32xf32>
    %c0_6 = arith.constant 0 : index
    %c0_7 = arith.constant 0 : index
    %8 = vector.load %arg4[%c0_6, %c0_7] : memref<8x32xf32, #tpu.memory_space<vmem>>, vector<8x32xf32>
    tpu.vector_store %arg4[%c0_6, %c0_7], %7 {strides = array<i32>} : memref<8x32xf32, #tpu.memory_space<vmem>>, vector<8x32xf32>,
    return
  }
  func.func @transform_0(%arg0: i32) -> (i32, i32) {
    %c0_i32 = arith.constant 0 : i32
    %c0_i32_0 = arith.constant 0 : i32
    return %arg0, %c0_i32 : i32, i32
  }
  func.func @transform_1(%arg0: i32) -> (i32, i32) {
    %c0_i32 = arith.constant 0 : i32
    %c0_i32_0 = arith.constant 0 : i32
    %c0_i32_1 = arith.constant 0 : i32
    return %c0_i32, %c0_i32_0 : i32, i32
  }
  func.func @transform_2(%arg0: i32) -> (i32, i32) {
    %c0_i32 = arith.constant 0 : i32
    %c0_i32_0 = arith.constant 0 : i32
    %c0_i32_1 = arith.constant 0 : i32
    return %c0_i32, %c0_i32_0 : i32, i32
  }
  func.func @transform_3(%arg0: i32) -> (i32, i32) {
    %c0_i32 = arith.constant 0 : i32
    %c0_i32_0 = arith.constant 0 : i32
    return %arg0, %c0_i32 : i32, i32
  }
}

</mosaic_0001>

<bundles_post_ra>
// kernel: tpu_custom_call.1
= control target key start
LH: loop header
LB: loop body
LE: loop exit
PB: predicated region body
PF: predicated region fallthrough
CT: control target
= control target key end

     0   :  { %8 = vsyncpa [#allocation3], 0  ;;  %s321_s0 = inlined_call_operand.hbm [shape: f32[8,10], index: 0, kind: input, shape index: {}]   ;;  %s322_s1 = inlined_call_operand.hbm [shape: f32[10,32], index: 1, kind: input, shape index: {}]   ;;  %s323_s2 = inlined_call_operand.vmem [shape: f32[1,32], index: 2, kind: input, shape index: {}]   ;;  %s324_s3 = inlined_call_operand.hbm [shape: f32[8,32], index: 3, kind: output, shape index: {}]  }
   0x1   :  { %9 = vsyncpa [#allocation6], 0 }
   0x2   :  { %10 = vsyncpa [#allocation4], 0  ;;  %s246_s12 = smov [#allocation2]   ;;  %s247_s14 = smov [#allocation5]  }
   0x3   :  { %s17_s13 = sshll.u32 %s246_s12, 4  ;;  %s26_s15 = sshll.u32 %s247_s14, 4  ;;  %s18_s13 = int_to_ptr.vmem [resolvable:$true] %s17_s13  ;;  %s275_s15 = int_to_ptr.vmem [resolvable:$true] %s26_s15 }
   0x4   :  { %s174_s18 = scalar_lea.hbm %s321_s0, 128 }
   0x5   :  { %p175_p0 = scmp.ne.s32.totalorder %s321_s0, %s174_s18  ;;  %p178_p1 = scmp.lt.u32.totalorder %s174_s18, %s321_s0 }
   0x7   :  { %p180_p2 = pnand %p178_p1, %p175_p0 }
   0x9   :  { %183 = shalt.err (!%p180_p2)
}
   0xa   :  { %s184_s23 = scalar_lea.vmem %s18_s13, 128  ;;  %p189_p4 = scmp.lt.s32.totalorder %s18_s13, %s18_s13 }
   0xb   :  { %p185_p3 = scmp.ne.s32.totalorder %s18_s13, %s184_s23  ;;  %p190_p5 = scmp.lt.s32.totalorder %s184_s23, %s184_s23 }
   0xd   :  { %p191_p6 = por %p190_p5, %p189_p4 }
   0xf   :  { %p192_p7 = pnand %p191_p6, %p185_p3 }
  0x11   :  { %195 = shalt.err (!%p192_p7)
}
  0x12   :  { %20 = dma.hbm_to_vmem [thread:$0]  %s321_s0, 128, %s18_s13, [#allocation3]  }
  0x13   :  { %s196_s28 = scalar_lea.hbm %s322_s1, 256 }
  0x14   :  { %p197_p8 = scmp.ne.s32.totalorder %s322_s1, %s196_s28  ;;  %p200_p9 = scmp.lt.u32.totalorder %s196_s28, %s322_s1 }
  0x16   :  { %p202_p10 = pnand %p200_p9, %p197_p8 }
  0x18   :  { %205 = shalt.err (!%p202_p10)
}
  0x19   :  { %s206_s6 = scalar_lea.vmem %s275_s15, 256  ;;  %p211_p12 = scmp.lt.s32.totalorder %s275_s15, %s275_s15 }
  0x1a   :  { %p207_p11 = scmp.ne.s32.totalorder %s275_s15, %s206_s6  ;;  %p212_p13 = scmp.lt.s32.totalorder %s206_s6, %s206_s6 }
  0x1c   :  { %p213_p0 = por %p212_p13, %p211_p12 }
  0x1e   :  { %p214_p1 = pnand %p213_p0, %p207_p11 }
  0x20   :  { %217 = shalt.err (!%p214_p1)
}
  0x21   :  { %s248_s0 = smov 128   ;;  %s249_s7 = smov 8  }
  0x22   :  { %32 = dma.hbm_to_vmem [thread:$0]  %s322_s1, 256, %s275_s15, [#allocation6], %s248_s0, %s248_s0, %s249_s7  }
  0x23   :  { %240 = dma.done.wait [#allocation3], 128  }
  0x24   :  { %241 = vsyncadd [#allocation3], 4294967168 }
  0x25   :  { %242 = dma.done.wait [#allocation6], 256  }
  0x26   :  { %243 = vsyncadd [#allocation6], 4294967040  ;;  %v250_v0 = vmov 0.0|0.0   ;;  %vm251_vm0 = vmmov 0   ;;  %v252_v1 = vmov 0.0   ;;  %vm55_vm1 = vcmask 1041408  }
  0x27   :  { %161 = vmatprep.subr.bf16.mxu0 %v250_v0  ;;  %158 = vmatprep.mubr.msk.f32.mxu0 %vm251_vm0, %v252_v1  ;;  %v42_v2 = vld [vmem:[#allocation5] sm:$0xff]  ;;  %v43_v3 = vld [vmem:[#allocation5 + $0x8] sm:$0x3]  ;;  %vm253_vm2 = vmmov 1   ;;  %v41_v5 = vld [vmem:[#allocation2] sm:$0xff]  ;;  %vm51_vm4 = vcmask 80896  }
  0x28   :  { %vm163_vm3 = vmpackc.low %vm55_vm1, %vm253_vm2  ;;  %v162_v4 = vpack.c.bf16 %v43_v3, %v42_v2  ;;  %v148_v6 = vld [vmem:[%s323_s2] ss:$0 sm:$0xff]  ;;  %s254_s11 = smov [#allocation7]   ;;  %vm130_vm5 = vcmask 261120  }
  0x29   :  { %s138_s12 = sshll.u32 %s254_s11, 4  ;;  %s139_s12 = int_to_ptr.vmem [resolvable:$true] %s138_s12 }
  0x2a   :  { %164 = vmatpush3.bf16.msk.msra.mxu0 %vm163_vm3, %v162_v4  ;;  %s218_s13 = scalar_lea.vmem %s139_s12, 128  ;;  %p223_p3 = scmp.lt.s32.totalorder %s139_s12, %s139_s12 }
  0x2b   :  { %p219_p2 = scmp.ne.s32.totalorder %s139_s12, %s218_s13  ;;  %p224_p4 = scmp.lt.s32.totalorder %s218_s13, %s218_s13 }
  0x2d   :  { %159 = vmatmul.mubr.msk.f32.vlgmr.msra.gmra.mrb[0].mxu0 %vm51_vm4, %v41_v5  ;;  %p225_p5 = por %p224_p4, %p223_p3 }
  0x2f   :  { %p226_p6 = pnand %p225_p5, %p219_p2 }
 0x100   :  { %v125_v7 = vpop.f32.mrb[0].mxu0 }
 0x101   :  { %v126_v8 = vadd.f32 %v148_v6, %v125_v7  ;;  %v160_v9 = vpop.f32.mrb[1].mxu0 }
 0x103   :  { %v129_v10 = vmax.f32 %v126_v8, 0.0 }
 0x105   :  { %131 = vst.msk [vmem:[#allocation7] sm:$0xff] %vm130_vm5, %v129_v10 }
 0x106   :  { %229 = shalt.err (!%p226_p6)
}
 0x107   :  { %s230_s2 = scalar_lea.hbm %s324_s3, 128 }
 0x108   :  { %p231_p7 = scmp.ne.s32.totalorder %s324_s3, %s230_s2  ;;  %p234_p8 = scmp.lt.u32.totalorder %s230_s2, %s324_s3 }
 0x10a   :  { %p236_p9 = pnand %p234_p8, %p231_p7 }
 0x10c   :  { %239 = shalt.err (!%p236_p9)
}
 0x10d   :  { %141 = dma.vmem_to_hbm [thread:$0]  %s139_s12, 128, %s324_s3, [#allocation4]  }
 0x10e   :  { %244 = dma.done.wait [#allocation4], 128  }
 0x10f   :  { %245 = vsyncadd [#allocation4], 4294967168 }
 0x110   :  { %145 = vsyncpa [#allocation3], 1 }
 0x111   :  { %146 = vsyncpa [#allocation6], 1 }
 0x112   :  { %147 = vsyncpa [#allocation4], 1 }

</bundles_post_ra>
